<compile_context>
chip_gen: v7x
topology: tpu7x:2x2x1
jax: 0.10.0
libtpu: 0.0.40
codegen_flags: <defaults>
</compile_context>

<pallas_src>
import jax
import jax.numpy as jnp
from jax import lax
from jax.experimental import pallas as pl
from jax.experimental.pallas import tpu as pltpu


def _caption_kernel(emb_ref, h0_ref, c0_ref, gbias_ref, we_ref, wh_ref,
                    wfc_ref, bfc_ref, out_ref, pre_ref, hs_ref):
    """S-step LSTM decode, everything VMEM-resident, single HBM writeback.

    emb_ref   : (S, B, E)    teacher-forced word embeddings (all steps)
    h0_ref    : (B, D)       init_h(image_vectors)
    c0_ref    : (B, D)       init_c(image_vectors)
    gbias_ref : (B, 4D)      loop-invariant gate term:
                             image_vectors @ W_ih[feature part] + b_ih + b_hh
                             (context == image_vectors exactly; see header)
    we_ref    : (E, 4D)      W_ih word-embedding part (gate order i,f,g,o)
    wh_ref    : (D, 4D)      W_hh
    wfc_ref   : (D, V1p)     fcn weight, vocab padded to a lane multiple
    bfc_ref   : (1, V1p)     fcn bias, padded
    out_ref   : (S*B, V1p)   predictions (lane-dense, one slab store)
    pre_ref   : (S, B, 4D)   scratch: precomputed word/feature gate terms
    hs_ref    : (S, B, D)    scratch: hidden states (fcn deferred off-chain)
    """
    S, B, E = emb_ref.shape
    D = h0_ref.shape[1]

    # ---- Prologue (off the serial chain) --------------------------------
    # word @ W_ih_e for ALL steps as one batched MXU matmul; fold in the
    # loop-invariant feature/bias term so the loop body adds nothing extra.
    emb2d = emb_ref[...].reshape(S * B, E)
    pre = jnp.dot(emb2d, we_ref[...], preferred_element_type=jnp.float32)
    pre_ref[...] = pre.reshape(S, B, 4 * D) + gbias_ref[...][None, :, :]

    wh = wh_ref[...]
    # Lane mask picking the tanh gate (g) out of the fused (B, 4D) gate vreg.
    # Hoisted: JAX does not CSE broadcast_in_dim across the unrolled loop.
    lane = lax.broadcasted_iota(jnp.int32, (B, 4 * D), 1)
    is_g = (lane >= 2 * D) & (lane < 3 * D)

    # ---- Recurrence: one MXU push + fused non-linearities per step ------
    def step(s, carry):
        h, c = carry
        # The ONLY matmul on the serial h->h critical path.
        gates = pre_ref[s] + jnp.dot(h, wh, preferred_element_type=jnp.float32)
        # One full-width tanh + one full-width sigmoid (EUP), lane-selected,
        # instead of four quarter-width calls.
        act = jnp.where(is_g, jnp.tanh(gates), jax.nn.sigmoid(gates))
        # Gate extraction: static lane slices (XLU lane shifts, off the
        # VALU/MXU slots); keeps h/c at their exact (B, D) width.
        i_g = act[:, 0 * D:1 * D]
        f_g = act[:, 1 * D:2 * D]
        g_g = act[:, 2 * D:3 * D]
        o_g = act[:, 3 * D:4 * D]
        c_new = f_g * c + i_g * g_g
        h_new = o_g * jnp.tanh(c_new)
        hs_ref[s] = h_new            # fcn projection deferred off the chain
        return (h_new, c_new)

    lax.fori_loop(0, S, step, (h0_ref[...], c0_ref[...]), unroll=True)

    # ---- Epilogue: one batched fcn matmul + single lane-dense store -----
    # dropout = identity in eval mode.
    hs = hs_ref[...].reshape(S * B, D)
    out_ref[...] = (jnp.dot(hs, wfc_ref[...], preferred_element_type=jnp.float32)
                    + bfc_ref[...])


def prepare_params(params):
    """One-time weight plumbing (kept OUT of the jitted per-call forward)."""
    V1 = params["wfc"].shape[1]
    V1_pad = ((V1 + 127) // 128) * 128
    return {
        "embed": params["embed"],
        # Fused F=2048 projection: init_h | init_c | W_ih feature part.
        "big_w": jnp.concatenate(
            [params["wh0"], params["wc0"], params["wih_f"]], axis=1),
        "big_b": jnp.concatenate(
            [params["bh0"], params["bc0"], params["bih"] + params["bhh"]],
            axis=1),
        "we": params["wih_e"],                       # (E, 4D), gates i,f,g,o
        "wh": params["whh"],                         # (D, 4D)
        "wfc": jnp.pad(params["wfc"], ((0, 0), (0, V1_pad - V1))),
        "bfc": jnp.pad(params["bfc"], ((0, 0), (0, V1_pad - V1))),
    }


def caption_model_forward(image_vectors, captions, prep, n_out):
    """Pallas implementation of CaptionModelAttention.forward
    (teacher-forced, eval mode).  `n_out` = vocab_size + 1 (static)."""
    F, sixD = prep["big_w"].shape
    D = sixD // 6
    E = prep["we"].shape[0]
    V1_pad = prep["wfc"].shape[1]
    B = image_vectors.shape[0]
    T = captions.shape[1]
    S = T - 1

    # The deleted attention softmax (alpha == 1) is only an exact identity
    # for single-region features.
    assert image_vectors.ndim == 2 and image_vectors.shape[1] == F, (
        "kernel assumes single-region (B, 2048) features; for (B, L, 2048) "
        "region features the attention-score path must be reinstated")

    B_pad = ((B + 7) // 8) * 8                     # one full sublane group
    pad_b = B_pad - B

    # ---- Glue (XLA): embedding gather; eval-mode dropout = identity ------
    emb = prep["embed"][captions[:, :S]]           # (B, S, E)
    emb_steps = jnp.transpose(emb, (1, 0, 2))      # (S, B, E)
    iv_p = jnp.pad(image_vectors, ((0, pad_b), (0, 0)))
    emb_p = jnp.pad(emb_steps, ((0, 0), (0, pad_b), (0, 0)))

    # ---- Loop-invariant hoist: ONE fused GEMM over F = 2048 --------------
    # softmax over the length-1 region axis is identically 1 => context ==
    # image_vectors, so init_h, init_c and the feature half of the LSTM gates
    # are all step-invariant; the attention-score path (W, U, A) has no effect
    # on the output and is dropped (exact identity).
    proj = iv_p @ prep["big_w"] + prep["big_b"]    # (B_pad, 6D)
    h0 = proj[:, :D]
    c0 = proj[:, D:2 * D]
    gbias = proj[:, 2 * D:]                        # (B_pad, 4D)

    flops = 2 * S * B_pad * (E * 4 * D + D * 4 * D + D * V1_pad)
    transcendentals = S * B_pad * (2 * 4 * D + D)
    bytes_accessed = 4 * (S * B_pad * E + 2 * B_pad * D + B_pad * 4 * D
                          + E * 4 * D + D * 4 * D + D * V1_pad + V1_pad
                          + S * B_pad * V1_pad)

    vmem = pltpu.MemorySpace.VMEM
    kernel_inputs = (emb_p, h0, c0, gbias, prep["we"], prep["wh"],
                     prep["wfc"], prep["bfc"])
    out2d = pl.pallas_call(
        _caption_kernel,
        out_shape=jax.ShapeDtypeStruct((S * B_pad, V1_pad), jnp.float32),
        in_specs=[pl.BlockSpec(memory_space=vmem) for _ in kernel_inputs],
        out_specs=pl.BlockSpec(memory_space=vmem),
        scratch_shapes=[pltpu.VMEM((S, B_pad, 4 * D), jnp.float32),
                        pltpu.VMEM((S, B_pad, D), jnp.float32)],
        cost_estimate=pl.CostEstimate(flops=flops,
                                      transcendentals=transcendentals,
                                      bytes_accessed=bytes_accessed),
    )(*kernel_inputs)

    out = out2d.reshape(S, B_pad, V1_pad)[:, :B, :n_out]
    return jnp.transpose(out, (1, 0, 2))           # (B, S, V+1)


def reference_forward(image_vectors, captions, params):
    """Pure-JAX reference (mirrors the PyTorch forward, teacher-forced, eval).

    Keeps the full attention path (incl. the degenerate softmax) so the exact
    identity used by the kernel (context == image_vectors) is verified.
    """
    emb = params["embed"][captions]
    S = captions.shape[1] - 1
    h = image_vectors @ params["wh0"] + params["bh0"]
    c = image_vectors @ params["wc0"] + params["bc0"]
    D = h.shape[-1]
    preds = []
    for s in range(S):
        w_hs = image_vectors @ params["wW"] + params["bW"]
        u_ah = h @ params["wU"] + params["bU"]
        comb = jnp.tanh(w_hs + u_ah)
        score = jnp.sum(comb * params["aV"], axis=-1, keepdims=True) + params["bA"]
        e = jnp.exp(score - jnp.max(score, axis=1, keepdims=True))
        alpha = e / jnp.sum(e, axis=1, keepdims=True)
        context = alpha * image_vectors
        word = emb[:, s]
        gates = (word @ params["wih_e"] + context @ params["wih_f"] + params["bih"]
                 + h @ params["whh"] + params["bhh"])
        i_g = jax.nn.sigmoid(gates[:, :D])
        f_g = jax.nn.sigmoid(gates[:, D:2 * D])
        g_g = jnp.tanh(gates[:, 2 * D:3 * D])
        o_g = jax.nn.sigmoid(gates[:, 3 * D:])
        c = f_g * c + i_g * g_g
        h = o_g * jnp.tanh(c)
        preds.append(h @ params["wfc"] + params["bfc"])
    return jnp.stack(preds, axis=1)


def init_params(key, vocab_size, decoder_dim, embed_dim, attention_dim,
                cnn_feature_size):
    """Deterministic synthetic weights (PyTorch-style uniform fan-in init)."""
    V1 = vocab_size + 1
    F, D, E, A = cnn_feature_size, decoder_dim, embed_dim, attention_dim

    def uni(k, shape, fan_in):
        bound = 1.0 / jnp.sqrt(jnp.float32(fan_in))
        return jax.random.uniform(k, shape, jnp.float32, -bound, bound)

    ks = jax.random.split(key, 20)
    p = {
        # Attention (dead for the forward output — softmax over one region)
        "wW": uni(ks[0], (F, A), F), "bW": uni(ks[1], (1, A), F),
        "wU": uni(ks[2], (D, A), D), "bU": uni(ks[3], (1, A), D),
        "aV": uni(ks[4], (1, A), A), "bA": uni(ks[5], (1, 1), A),
        # init_h / init_c
        "wh0": uni(ks[6], (F, D), F), "bh0": uni(ks[7], (1, D), F),
        "wc0": uni(ks[8], (F, D), F), "bc0": uni(ks[9], (1, D), F),
        # Embedding
        "embed": jax.random.normal(ks[10], (V1, E), jnp.float32),
        # LSTMCell (W_ih split into embed part and feature part; gates i,f,g,o)
        "wih_e": uni(ks[11], (E, 4 * D), E + F),
        "wih_f": uni(ks[12], (F, 4 * D), E + F),
        "bih":   uni(ks[13], (1, 4 * D), E + F),
        "whh":   uni(ks[14], (D, 4 * D), D),
        "bhh":   uni(ks[15], (1, 4 * D), D),
        # fcn
        "wfc": uni(ks[16], (D, V1), D), "bfc": uni(ks[17], (1, V1), D),
    }
    return p


if __name__ == "__main__":
    # Small, forward-consistent shapes.
    B = 2                     # batch
    T = 8                     # caption length  -> seq_length = 7
    vocab_size = 20           # -> V+1 = 21
    decoder_dim = 32
    embed_dim = 32
    attention_dim = 16
    cnn_feature_size = 2048   # hardcoded in Attention (nn.Linear(2048, ...))

    key = jax.random.PRNGKey(0)
    k_img, k_cap, k_par = jax.random.split(key, 3)

    image_vectors = jax.random.normal(k_img, (B, cnn_feature_size), jnp.float32)
    captions = jax.random.randint(k_cap, (B, T), 0, vocab_size + 1, jnp.int32)
    params = init_params(k_par, vocab_size, decoder_dim, embed_dim,
                         attention_dim, cnn_feature_size)

    # One-time weight plumbing, hoisted out of the jitted per-call forward.
    prep = prepare_params(params)

    fwd = jax.jit(caption_model_forward, static_argnames=("n_out",))
    preds = fwd(image_vectors, captions, prep, n_out=vocab_size + 1)
    preds = jax.block_until_ready(preds)

    ref = reference_forward(image_vectors, captions, params)
    assert preds.shape == (B, T - 1, vocab_size + 1)
    assert jnp.allclose(preds, ref, rtol=1e-3, atol=1e-3), \
        float(jnp.max(jnp.abs(preds - ref)))

    print("KERNEL_OK")
</pallas_src>

<mosaic_0001>
module attributes {stable_mosaic.version = 11 : i64} {
  func.func @_caption_kernel(%arg0: memref<7x8x32xf32, #tpu.memory_space<vmem>>, %arg1: memref<8x32xf32, #tpu.memory_space<vmem>>, %arg2: memref<8x32xf32, #tpu.memory_space<vmem>>, %arg3: memref<8x128xf32, #tpu.memory_space<vmem>>, %arg4: memref<32x128xf32, #tpu.memory_space<vmem>>, %arg5: memref<32x128xf32, #tpu.memory_space<vmem>>, %arg6: memref<32x128xf32, #tpu.memory_space<vmem>>, %arg7: memref<1x128xf32, #tpu.memory_space<vmem>>, %arg8: memref<56x128xf32, #tpu.memory_space<vmem>>, %arg9: memref<7x8x128xf32, #tpu.memory_space<vmem>>, %arg10: memref<7x8x32xf32, #tpu.memory_space<vmem>>) attributes {dimension_semantics = [], scalar_prefetch = 0 : i64, scratch_operands = 2 : i64, tpu.core_type = #tpu.core_type<tc>} {
    %c0 = arith.constant 0 : index
    %c0_0 = arith.constant 0 : index
    %c0_1 = arith.constant 0 : index
    %0 = vector.load %arg0[%c0, %c0_0, %c0_1] : memref<7x8x32xf32, #tpu.memory_space<vmem>>, vector<7x8x32xf32>
    %1 = vector.shape_cast %0 : vector<7x8x32xf32> to vector<56x32xf32>
    %c0_2 = arith.constant 0 : index
    %c0_3 = arith.constant 0 : index
    %2 = vector.load %arg4[%c0_2, %c0_3] : memref<32x128xf32, #tpu.memory_space<vmem>>, vector<32x128xf32>
    %cst = arith.constant dense<0.000000e+00> : vector<56x128xf32>
    %3 = tpu.matmul %1, %2, %cst {dimension_numbers = #tpu.dot_dimension_numbers<[1], [0], [0], [1], [0, 0, 1, 1], [], []>} : vector<56x32xf32>, vector<32x128xf32>, vector<56x128xf32> -> vector<56x128xf32>
    %4 = vector.shape_cast %3 : vector<56x128xf32> to vector<7x8x128xf32>
    %c0_4 = arith.constant 0 : index
    %c0_5 = arith.constant 0 : index
    %5 = vector.load %arg3[%c0_4, %c0_5] : memref<8x128xf32, #tpu.memory_space<vmem>>, vector<8x128xf32>
    %6 = vector.shape_cast %5 : vector<8x128xf32> to vector<1x8x128xf32>
    %7 = vector.broadcast %6 : vector<1x8x128xf32> to vector<7x8x128xf32>
    %8 = arith.addf %4, %7 : vector<7x8x128xf32>
    %c0_6 = arith.constant 0 : index
    %c0_7 = arith.constant 0 : index
    %c0_8 = arith.constant 0 : index
    %9 = vector.load %arg9[%c0_6, %c0_7, %c0_8] : memref<7x8x128xf32, #tpu.memory_space<vmem>>, vector<7x8x128xf32>
    tpu.vector_store %arg9[%c0_6, %c0_7, %c0_8], %8 {strides = array<i32>} : memref<7x8x128xf32, #tpu.memory_space<vmem>>, vector<7x8x128xf32>,
    %c0_9 = arith.constant 0 : index
    %c0_10 = arith.constant 0 : index
    %10 = vector.load %arg5[%c0_9, %c0_10] : memref<32x128xf32, #tpu.memory_space<vmem>>, vector<32x128xf32>
    %11 = tpu.iota {dimensions = array<i32: 1>} : vector<8x128xi32>
    %c64_i32 = arith.constant 64 : i32
    %12 = vector.broadcast %c64_i32 : i32 to vector<8x128xi32>
    %13 = arith.cmpi sge, %11, %12 : vector<8x128xi32>
    %c96_i32 = arith.constant 96 : i32
    %14 = vector.broadcast %c96_i32 : i32 to vector<8x128xi32>
    %15 = arith.cmpi slt, %11, %14 : vector<8x128xi32>
    %16 = arith.andi %13, %15 : vector<8x128xi1>
    %c0_11 = arith.constant 0 : index
    %c0_12 = arith.constant 0 : index
    %17 = vector.load %arg1[%c0_11, %c0_12] : memref<8x32xf32, #tpu.memory_space<vmem>>, vector<8x32xf32>
    %c0_13 = arith.constant 0 : index
    %c0_14 = arith.constant 0 : index
    %18 = vector.load %arg2[%c0_13, %c0_14] : memref<8x32xf32, #tpu.memory_space<vmem>>, vector<8x32xf32>
    %c0_i32 = arith.constant 0 : i32
    %19 = arith.index_cast %c0_i32 : i32 to index
    %c0_15 = arith.constant 0 : index
    %c0_16 = arith.constant 0 : index
    %20 = vector.load %arg9[%19, %c0_15, %c0_16] : memref<7x8x128xf32, #tpu.memory_space<vmem>>, vector<1x8x128xf32>
    %21 = vector.shape_cast %20 : vector<1x8x128xf32> to vector<8x128xf32>
    %cst_17 = arith.constant dense<0.000000e+00> : vector<8x128xf32>
    %22 = tpu.matmul %17, %10, %cst_17 {dimension_numbers = #tpu.dot_dimension_numbers<[1], [0], [0], [1], [0, 0, 1, 1], [], []>} : vector<8x32xf32>, vector<32x128xf32>, vector<8x128xf32> -> vector<8x128xf32>
    %23 = arith.addf %21, %22 : vector<8x128xf32>
    %24 = math.tanh %23 : vector<8x128xf32>
    %25 = arith.negf %23 : vector<8x128xf32>
    %26 = math.exp %25 : vector<8x128xf32>
    %cst_18 = arith.constant 1.000000e+00 : f32
    %27 = vector.broadcast %cst_18 : f32 to vector<8x128xf32>
    %28 = arith.addf %27, %26 : vector<8x128xf32>
    %29 = arith.divf %27, %28 : vector<8x128xf32>
    %30 = arith.select %16, %24, %29 : vector<8x128xi1>, vector<8x128xf32>
    %31 = vector.extract_strided_slice %30 {offsets = [0, 0], sizes = [8, 32], strides = [1, 1]} : vector<8x128xf32> to vector<8x32xf32>
    %32 = vector.extract_strided_slice %30 {offsets = [0, 32], sizes = [8, 32], strides = [1, 1]} : vector<8x128xf32> to vector<8x32xf32>
    %33 = vector.extract_strided_slice %30 {offsets = [0, 64], sizes = [8, 32], strides = [1, 1]} : vector<8x128xf32> to vector<8x32xf32>
    %34 = vector.extract_strided_slice %30 {offsets = [0, 96], sizes = [8, 32], strides = [1, 1]} : vector<8x128xf32> to vector<8x32xf32>
    %35 = arith.mulf %32, %18 : vector<8x32xf32>
    %36 = arith.mulf %31, %33 : vector<8x32xf32>
    %37 = arith.addf %35, %36 : vector<8x32xf32>
    %38 = math.tanh %37 : vector<8x32xf32>
    %39 = arith.mulf %34, %38 : vector<8x32xf32>
    %40 = arith.index_cast %c0_i32 : i32 to index
    %c0_19 = arith.constant 0 : index
    %c0_20 = arith.constant 0 : index
    %41 = vector.load %arg10[%40, %c0_19, %c0_20] : memref<7x8x32xf32, #tpu.memory_space<vmem>>, vector<1x8x32xf32>
    %42 = vector.shape_cast %41 : vector<1x8x32xf32> to vector<8x32xf32>
    %43 = vector.shape_cast %39 : vector<8x32xf32> to vector<1x8x32xf32>
    tpu.vector_store %arg10[%40, %c0_19, %c0_20], %43 {strides = array<i32>} : memref<7x8x32xf32, #tpu.memory_space<vmem>>, vector<1x8x32xf32>,
    %c1_i32 = arith.constant 1 : i32
    %44 = arith.index_cast %c1_i32 : i32 to index
    %c0_21 = arith.constant 0 : index
    %c0_22 = arith.constant 0 : index
    %45 = vector.load %arg9[%44, %c0_21, %c0_22] : memref<7x8x128xf32, #tpu.memory_space<vmem>>, vector<1x8x128xf32>
    %46 = vector.shape_cast %45 : vector<1x8x128xf32> to vector<8x128xf32>
    %cst_23 = arith.constant dense<0.000000e+00> : vector<8x128xf32>
    %47 = tpu.matmul %39, %10, %cst_23 {dimension_numbers = #tpu.dot_dimension_numbers<[1], [0], [0], [1], [0, 0, 1, 1], [], []>} : vector<8x32xf32>, vector<32x128xf32>, vector<8x128xf32> -> vector<8x128xf32>
    %48 = arith.addf %46, %47 : vector<8x128xf32>
    %49 = math.tanh %48 : vector<8x128xf32>
    %50 = arith.negf %48 : vector<8x128xf32>
    %51 = math.exp %50 : vector<8x128xf32>
    %cst_24 = arith.constant 1.000000e+00 : f32
    %52 = vector.broadcast %cst_24 : f32 to vector<8x128xf32>
    %53 = arith.addf %52, %51 : vector<8x128xf32>
    %54 = arith.divf %52, %53 : vector<8x128xf32>
    %55 = arith.select %16, %49, %54 : vector<8x128xi1>, vector<8x128xf32>
    %56 = vector.extract_strided_slice %55 {offsets = [0, 0], sizes = [8, 32], strides = [1, 1]} : vector<8x128xf32> to vector<8x32xf32>
    %57 = vector.extract_strided_slice %55 {offsets = [0, 32], sizes = [8, 32], strides = [1, 1]} : vector<8x128xf32> to vector<8x32xf32>
    %58 = vector.extract_strided_slice %55 {offsets = [0, 64], sizes = [8, 32], strides = [1, 1]} : vector<8x128xf32> to vector<8x32xf32>
    %59 = vector.extract_strided_slice %55 {offsets = [0, 96], sizes = [8, 32], strides = [1, 1]} : vector<8x128xf32> to vector<8x32xf32>
    %60 = arith.mulf %57, %37 : vector<8x32xf32>
    %61 = arith.mulf %56, %58 : vector<8x32xf32>
    %62 = arith.addf %60, %61 : vector<8x32xf32>
    %63 = math.tanh %62 : vector<8x32xf32>
    %64 = arith.mulf %59, %63 : vector<8x32xf32>
    %65 = arith.index_cast %c1_i32 : i32 to index
    %c0_25 = arith.constant 0 : index
    %c0_26 = arith.constant 0 : index
    %66 = vector.load %arg10[%65, %c0_25, %c0_26] : memref<7x8x32xf32, #tpu.memory_space<vmem>>, vector<1x8x32xf32>
    %67 = vector.shape_cast %66 : vector<1x8x32xf32> to vector<8x32xf32>
    %68 = vector.shape_cast %64 : vector<8x32xf32> to vector<1x8x32xf32>
    tpu.vector_store %arg10[%65, %c0_25, %c0_26], %68 {strides = array<i32>} : memref<7x8x32xf32, #tpu.memory_space<vmem>>, vector<1x8x32xf32>,
    %c2_i32 = arith.constant 2 : i32
    %69 = arith.index_cast %c2_i32 : i32 to index
    %c0_27 = arith.constant 0 : index
    %c0_28 = arith.constant 0 : index
    %70 = vector.load %arg9[%69, %c0_27, %c0_28] : memref<7x8x128xf32, #tpu.memory_space<vmem>>, vector<1x8x128xf32>
    %71 = vector.shape_cast %70 : vector<1x8x128xf32> to vector<8x128xf32>
    %cst_29 = arith.constant dense<0.000000e+00> : vector<8x128xf32>
    %72 = tpu.matmul %64, %10, %cst_29 {dimension_numbers = #tpu.dot_dimension_numbers<[1], [0], [0], [1], [0, 0, 1, 1], [], []>} : vector<8x32xf32>, vector<32x128xf32>, vector<8x128xf32> -> vector<8x128xf32>
    %73 = arith.addf %71, %72 : vector<8x128xf32>
    %74 = math.tanh %73 : vector<8x128xf32>
    %75 = arith.negf %73 : vector<8x128xf32>
    %76 = math.exp %75 : vector<8x128xf32>
    %cst_30 = arith.constant 1.000000e+00 : f32
    %77 = vector.broadcast %cst_30 : f32 to vector<8x128xf32>
    %78 = arith.addf %77, %76 : vector<8x128xf32>
    %79 = arith.divf %77, %78 : vector<8x128xf32>
    %80 = arith.select %16, %74, %79 : vector<8x128xi1>, vector<8x128xf32>
    %81 = vector.extract_strided_slice %80 {offsets = [0, 0], sizes = [8, 32], strides = [1, 1]} : vector<8x128xf32> to vector<8x32xf32>
    %82 = vector.extract_strided_slice %80 {offsets = [0, 32], sizes = [8, 32], strides = [1, 1]} : vector<8x128xf32> to vector<8x32xf32>
    %83 = vector.extract_strided_slice %80 {offsets = [0, 64], sizes = [8, 32], strides = [1, 1]} : vector<8x128xf32> to vector<8x32xf32>
    %84 = vector.extract_strided_slice %80 {offsets = [0, 96], sizes = [8, 32], strides = [1, 1]} : vector<8x128xf32> to vector<8x32xf32>
    %85 = arith.mulf %82, %62 : vector<8x32xf32>
    %86 = arith.mulf %81, %83 : vector<8x32xf32>
    %87 = arith.addf %85, %86 : vector<8x32xf32>
    %88 = math.tanh %87 : vector<8x32xf32>
    %89 = arith.mulf %84, %88 : vector<8x32xf32>
    %90 = arith.index_cast %c2_i32 : i32 to index
    %c0_31 = arith.constant 0 : index
    %c0_32 = arith.constant 0 : index
    %91 = vector.load %arg10[%90, %c0_31, %c0_32] : memref<7x8x32xf32, #tpu.memory_space<vmem>>, vector<1x8x32xf32>
    %92 = vector.shape_cast %91 : vector<1x8x32xf32> to vector<8x32xf32>
    %93 = vector.shape_cast %89 : vector<8x32xf32> to vector<1x8x32xf32>
    tpu.vector_store %arg10[%90, %c0_31, %c0_32], %93 {strides = array<i32>} : memref<7x8x32xf32, #tpu.memory_space<vmem>>, vector<1x8x32xf32>,
    %c3_i32 = arith.constant 3 : i32
    %94 = arith.index_cast %c3_i32 : i32 to index
    %c0_33 = arith.constant 0 : index
    %c0_34 = arith.constant 0 : index
    %95 = vector.load %arg9[%94, %c0_33, %c0_34] : memref<7x8x128xf32, #tpu.memory_space<vmem>>, vector<1x8x128xf32>
    %96 = vector.shape_cast %95 : vector<1x8x128xf32> to vector<8x128xf32>
    %cst_35 = arith.constant dense<0.000000e+00> : vector<8x128xf32>
    %97 = tpu.matmul %89, %10, %cst_35 {dimension_numbers = #tpu.dot_dimension_numbers<[1], [0], [0], [1], [0, 0, 1, 1], [], []>} : vector<8x32xf32>, vector<32x128xf32>, vector<8x128xf32> -> vector<8x128xf32>
    %98 = arith.addf %96, %97 : vector<8x128xf32>
    %99 = math.tanh %98 : vector<8x128xf32>
    %100 = arith.negf %98 : vector<8x128xf32>
    %101 = math.exp %100 : vector<8x128xf32>
    %cst_36 = arith.constant 1.000000e+00 : f32
    %102 = vector.broadcast %cst_36 : f32 to vector<8x128xf32>
    %103 = arith.addf %102, %101 : vector<8x128xf32>
    %104 = arith.divf %102, %103 : vector<8x128xf32>
    %105 = arith.select %16, %99, %104 : vector<8x128xi1>, vector<8x128xf32>
    %106 = vector.extract_strided_slice %105 {offsets = [0, 0], sizes = [8, 32], strides = [1, 1]} : vector<8x128xf32> to vector<8x32xf32>
    %107 = vector.extract_strided_slice %105 {offsets = [0, 32], sizes = [8, 32], strides = [1, 1]} : vector<8x128xf32> to vector<8x32xf32>
    %108 = vector.extract_strided_slice %105 {offsets = [0, 64], sizes = [8, 32], strides = [1, 1]} : vector<8x128xf32> to vector<8x32xf32>
    %109 = vector.extract_strided_slice %105 {offsets = [0, 96], sizes = [8, 32], strides = [1, 1]} : vector<8x128xf32> to vector<8x32xf32>
    %110 = arith.mulf %107, %87 : vector<8x32xf32>
    %111 = arith.mulf %106, %108 : vector<8x32xf32>
    %112 = arith.addf %110, %111 : vector<8x32xf32>
    %113 = math.tanh %112 : vector<8x32xf32>
    %114 = arith.mulf %109, %113 : vector<8x32xf32>
    %115 = arith.index_cast %c3_i32 : i32 to index
    %c0_37 = arith.constant 0 : index
    %c0_38 = arith.constant 0 : index
    %116 = vector.load %arg10[%115, %c0_37, %c0_38] : memref<7x8x32xf32, #tpu.memory_space<vmem>>, vector<1x8x32xf32>
    %117 = vector.shape_cast %116 : vector<1x8x32xf32> to vector<8x32xf32>
    %118 = vector.shape_cast %114 : vector<8x32xf32> to vector<1x8x32xf32>
    tpu.vector_store %arg10[%115, %c0_37, %c0_38], %118 {strides = array<i32>} : memref<7x8x32xf32, #tpu.memory_space<vmem>>, vector<1x8x32xf32>,
    %c4_i32 = arith.constant 4 : i32
    %119 = arith.index_cast %c4_i32 : i32 to index
    %c0_39 = arith.constant 0 : index
    %c0_40 = arith.constant 0 : index
    %120 = vector.load %arg9[%119, %c0_39, %c0_40] : memref<7x8x128xf32, #tpu.memory_space<vmem>>, vector<1x8x128xf32>
    %121 = vector.shape_cast %120 : vector<1x8x128xf32> to vector<8x128xf32>
    %cst_41 = arith.constant dense<0.000000e+00> : vector<8x128xf32>
    %122 = tpu.matmul %114, %10, %cst_41 {dimension_numbers = #tpu.dot_dimension_numbers<[1], [0], [0], [1], [0, 0, 1, 1], [], []>} : vector<8x32xf32>, vector<32x128xf32>, vector<8x128xf32> -> vector<8x128xf32>
    %123 = arith.addf %121, %122 : vector<8x128xf32>
    %124 = math.tanh %123 : vector<8x128xf32>
    %125 = arith.negf %123 : vector<8x128xf32>
    %126 = math.exp %125 : vector<8x128xf32>
    %cst_42 = arith.constant 1.000000e+00 : f32
    %127 = vector.broadcast %cst_42 : f32 to vector<8x128xf32>
    %128 = arith.addf %127, %126 : vector<8x128xf32>
    %129 = arith.divf %127, %128 : vector<8x128xf32>
    %130 = arith.select %16, %124, %129 : vector<8x128xi1>, vector<8x128xf32>
    %131 = vector.extract_strided_slice %130 {offsets = [0, 0], sizes = [8, 32], strides = [1, 1]} : vector<8x128xf32> to vector<8x32xf32>
    %132 = vector.extract_strided_slice %130 {offsets = [0, 32], sizes = [8, 32], strides = [1, 1]} : vector<8x128xf32> to vector<8x32xf32>
    %133 = vector.extract_strided_slice %130 {offsets = [0, 64], sizes = [8, 32], strides = [1, 1]} : vector<8x128xf32> to vector<8x32xf32>
    %134 = vector.extract_strided_slice %130 {offsets = [0, 96], sizes = [8, 32], strides = [1, 1]} : vector<8x128xf32> to vector<8x32xf32>
    %135 = arith.mulf %132, %112 : vector<8x32xf32>
    %136 = arith.mulf %131, %133 : vector<8x32xf32>
    %137 = arith.addf %135, %136 : vector<8x32xf32>
    %138 = math.tanh %137 : vector<8x32xf32>
    %139 = arith.mulf %134, %138 : vector<8x32xf32>
    %140 = arith.index_cast %c4_i32 : i32 to index
    %c0_43 = arith.constant 0 : index
    %c0_44 = arith.constant 0 : index
    %141 = vector.load %arg10[%140, %c0_43, %c0_44] : memref<7x8x32xf32, #tpu.memory_space<vmem>>, vector<1x8x32xf32>
    %142 = vector.shape_cast %141 : vector<1x8x32xf32> to vector<8x32xf32>
    %143 = vector.shape_cast %139 : vector<8x32xf32> to vector<1x8x32xf32>
    tpu.vector_store %arg10[%140, %c0_43, %c0_44], %143 {strides = array<i32>} : memref<7x8x32xf32, #tpu.memory_space<vmem>>, vector<1x8x32xf32>,
    %c5_i32 = arith.constant 5 : i32
    %144 = arith.index_cast %c5_i32 : i32 to index
    %c0_45 = arith.constant 0 : index
    %c0_46 = arith.constant 0 : index
    %145 = vector.load %arg9[%144, %c0_45, %c0_46] : memref<7x8x128xf32, #tpu.memory_space<vmem>>, vector<1x8x128xf32>
    %146 = vector.shape_cast %145 : vector<1x8x128xf32> to vector<8x128xf32>
    %cst_47 = arith.constant dense<0.000000e+00> : vector<8x128xf32>
    %147 = tpu.matmul %139, %10, %cst_47 {dimension_numbers = #tpu.dot_dimension_numbers<[1], [0], [0], [1], [0, 0, 1, 1], [], []>} : vector<8x32xf32>, vector<32x128xf32>, vector<8x128xf32> -> vector<8x128xf32>
    %148 = arith.addf %146, %147 : vector<8x128xf32>
    %149 = math.tanh %148 : vector<8x128xf32>
    %150 = arith.negf %148 : vector<8x128xf32>
    %151 = math.exp %150 : vector<8x128xf32>
    %cst_48 = arith.constant 1.000000e+00 : f32
    %152 = vector.broadcast %cst_48 : f32 to vector<8x128xf32>
    %153 = arith.addf %152, %151 : vector<8x128xf32>
    %154 = arith.divf %152, %153 : vector<8x128xf32>
    %155 = arith.select %16, %149, %154 : vector<8x128xi1>, vector<8x128xf32>
    %156 = vector.extract_strided_slice %155 {offsets = [0, 0], sizes = [8, 32], strides = [1, 1]} : vector<8x128xf32> to vector<8x32xf32>
    %157 = vector.extract_strided_slice %155 {offsets = [0, 32], sizes = [8, 32], strides = [1, 1]} : vector<8x128xf32> to vector<8x32xf32>
    %158 = vector.extract_strided_slice %155 {offsets = [0, 64], sizes = [8, 32], strides = [1, 1]} : vector<8x128xf32> to vector<8x32xf32>
    %159 = vector.extract_strided_slice %155 {offsets = [0, 96], sizes = [8, 32], strides = [1, 1]} : vector<8x128xf32> to vector<8x32xf32>
    %160 = arith.mulf %157, %137 : vector<8x32xf32>
    %161 = arith.mulf %156, %158 : vector<8x32xf32>
    %162 = arith.addf %160, %161 : vector<8x32xf32>
    %163 = math.tanh %162 : vector<8x32xf32>
    %164 = arith.mulf %159, %163 : vector<8x32xf32>
    %165 = arith.index_cast %c5_i32 : i32 to index
    %c0_49 = arith.constant 0 : index
    %c0_50 = arith.constant 0 : index
    %166 = vector.load %arg10[%165, %c0_49, %c0_50] : memref<7x8x32xf32, #tpu.memory_space<vmem>>, vector<1x8x32xf32>
    %167 = vector.shape_cast %166 : vector<1x8x32xf32> to vector<8x32xf32>
    %168 = vector.shape_cast %164 : vector<8x32xf32> to vector<1x8x32xf32>
    tpu.vector_store %arg10[%165, %c0_49, %c0_50], %168 {strides = array<i32>} : memref<7x8x32xf32, #tpu.memory_space<vmem>>, vector<1x8x32xf32>,
    %c6_i32 = arith.constant 6 : i32
    %169 = arith.index_cast %c6_i32 : i32 to index
    %c0_51 = arith.constant 0 : index
    %c0_52 = arith.constant 0 : index
    %170 = vector.load %arg9[%169, %c0_51, %c0_52] : memref<7x8x128xf32, #tpu.memory_space<vmem>>, vector<1x8x128xf32>
    %171 = vector.shape_cast %170 : vector<1x8x128xf32> to vector<8x128xf32>
    %cst_53 = arith.constant dense<0.000000e+00> : vector<8x128xf32>
    %172 = tpu.matmul %164, %10, %cst_53 {dimension_numbers = #tpu.dot_dimension_numbers<[1], [0], [0], [1], [0, 0, 1, 1], [], []>} : vector<8x32xf32>, vector<32x128xf32>, vector<8x128xf32> -> vector<8x128xf32>
    %173 = arith.addf %171, %172 : vector<8x128xf32>
    %174 = math.tanh %173 : vector<8x128xf32>
    %175 = arith.negf %173 : vector<8x128xf32>
    %176 = math.exp %175 : vector<8x128xf32>
    %cst_54 = arith.constant 1.000000e+00 : f32
    %177 = vector.broadcast %cst_54 : f32 to vector<8x128xf32>
    %178 = arith.addf %177, %176 : vector<8x128xf32>
    %179 = arith.divf %177, %178 : vector<8x128xf32>
    %180 = arith.select %16, %174, %179 : vector<8x128xi1>, vector<8x128xf32>
    %181 = vector.extract_strided_slice %180 {offsets = [0, 0], sizes = [8, 32], strides = [1, 1]} : vector<8x128xf32> to vector<8x32xf32>
    %182 = vector.extract_strided_slice %180 {offsets = [0, 32], sizes = [8, 32], strides = [1, 1]} : vector<8x128xf32> to vector<8x32xf32>
    %183 = vector.extract_strided_slice %180 {offsets = [0, 64], sizes = [8, 32], strides = [1, 1]} : vector<8x128xf32> to vector<8x32xf32>
    %184 = vector.extract_strided_slice %180 {offsets = [0, 96], sizes = [8, 32], strides = [1, 1]} : vector<8x128xf32> to vector<8x32xf32>
    %185 = arith.mulf %182, %162 : vector<8x32xf32>
    %186 = arith.mulf %181, %183 : vector<8x32xf32>
    %187 = arith.addf %185, %186 : vector<8x32xf32>
    %188 = math.tanh %187 : vector<8x32xf32>
    %189 = arith.mulf %184, %188 : vector<8x32xf32>
    %190 = arith.index_cast %c6_i32 : i32 to index
    %c0_55 = arith.constant 0 : index
    %c0_56 = arith.constant 0 : index
    %191 = vector.load %arg10[%190, %c0_55, %c0_56] : memref<7x8x32xf32, #tpu.memory_space<vmem>>, vector<1x8x32xf32>
    %192 = vector.shape_cast %191 : vector<1x8x32xf32> to vector<8x32xf32>
    %193 = vector.shape_cast %189 : vector<8x32xf32> to vector<1x8x32xf32>
    tpu.vector_store %arg10[%190, %c0_55, %c0_56], %193 {strides = array<i32>} : memref<7x8x32xf32, #tpu.memory_space<vmem>>, vector<1x8x32xf32>,
    %c7_i32 = arith.constant 7 : i32
    %c0_57 = arith.constant 0 : index
    %c0_58 = arith.constant 0 : index
    %c0_59 = arith.constant 0 : index
    %194 = vector.load %arg10[%c0_57, %c0_58, %c0_59] : memref<7x8x32xf32, #tpu.memory_space<vmem>>, vector<7x8x32xf32>
    %195 = vector.shape_cast %194 : vector<7x8x32xf32> to vector<56x32xf32>
    %c0_60 = arith.constant 0 : index
    %c0_61 = arith.constant 0 : index
    %196 = vector.load %arg6[%c0_60, %c0_61] : memref<32x128xf32, #tpu.memory_space<vmem>>, vector<32x128xf32>
    %cst_62 = arith.constant dense<0.000000e+00> : vector<56x128xf32>
    %197 = tpu.matmul %195, %196, %cst_62 {dimension_numbers = #tpu.dot_dimension_numbers<[1], [0], [0], [1], [0, 0, 1, 1], [], []>} : vector<56x32xf32>, vector<32x128xf32>, vector<56x128xf32> -> vector<56x128xf32>
    %c0_63 = arith.constant 0 : index
    %c0_64 = arith.constant 0 : index
    %198 = vector.load %arg7[%c0_63, %c0_64] : memref<1x128xf32, #tpu.memory_space<vmem>>, vector<1x128xf32>
    %199 = vector.broadcast %198 : vector<1x128xf32> to vector<56x128xf32>
    %200 = arith.addf %197, %199 : vector<56x128xf32>
    %c0_65 = arith.constant 0 : index
    %c0_66 = arith.constant 0 : index
    %201 = vector.load %arg8[%c0_65, %c0_66] : memref<56x128xf32, #tpu.memory_space<vmem>>, vector<56x128xf32>
    tpu.vector_store %arg8[%c0_65, %c0_66], %200 {strides = array<i32>} : memref<56x128xf32, #tpu.memory_space<vmem>>, vector<56x128xf32>,
    return
  }
}

</mosaic_0001>

<bundles_post_ra>
// kernel: caption_model_forward.1
= control target key start
LH: loop header
LB: loop body
LE: loop exit
PB: predicated region body
PF: predicated region fallthrough
CT: control target
= control target key end

     0   :  { %v1433_v0 = vmov 0.0|0.0   ;;  %vm1434_vm0 = vmmov 0   ;;  %v1435_v8 = vmov 0.0   ;;  %vm40_vm1 = vcmask 261120   ;;  %s1437_s26 = smov 32   ;;  %s1763_s4 = inlined_call_operand.vmem [shape: f32[32,128], index: 4, kind: input, shape index: {}]   ;;  %s1764_s5 = inlined_call_operand.vmem [shape: f32[32,128], index: 5, kind: input, shape index: {}]   ;;  %s1765_s0 = inlined_call_operand.vmem [shape: f32[7,8,32], index: 0, kind: input, shape index: {}]   ;;  %s1766_s1 = inlined_call_operand.vmem [shape: f32[8,32], index: 1, kind: input, shape index: {}]   ;;  %s1767_s3 = inlined_call_operand.vmem [shape: f32[8,128], index: 3, kind: input, shape index: {}]   ;;  %s1768_s2 = inlined_call_operand.vmem [shape: f32[8,32], index: 2, kind: input, shape index: {}]   ;;  %s1769_s6 = inlined_call_operand.vmem [shape: f32[32,128], index: 6, kind: input, shape index: {}]   ;;  %s1770_s7 = inlined_call_operand.vmem [shape: f32[1,128], index: 7, kind: input, shape index: {}]   ;;  %s1771_s8 = inlined_call_operand.vmem [shape: f32[56,128], index: 8, kind: output, shape index: {}]  }
   0x1   :  { %1304 = vmatprep.subr.bf16.mxu1 %v1433_v0  ;;  %v36_v1 = vld [vmem:[%s1763_s4] sm:$0xff]  ;;  %v37_v2 = vld [vmem:[%s1763_s4 + $0x8] sm:$0xff]  ;;  %1310 = vmatprep.subr.bf16.mxu0 %v1433_v0  ;;  %v38_v6 = vld [vmem:[%s1763_s4 + $0x10] sm:$0xff]  ;;  %v181_v25 = vlaneseq }
   0x2   :  { %v177_v3 = vld [vmem:[%s1764_s5] sm:$0xff]  ;;  %v1305_v4 = vpack.c.bf16 %v37_v2, %v36_v1  ;;  %v178_v5 = vld [vmem:[%s1764_s5 + $0x8] sm:$0xff]  ;;  %v39_v7 = vld [vmem:[%s1763_s4 + $0x18] sm:$0xff]  ;;  %1177 = vmatprep.mubr.msk.f32.mxu1 %vm1434_vm0, %v1435_v8  ;;  %1206 = vmatprep.mubr.msk.f32.mxu0 %vm1434_vm0, %v1435_v8 }
   0x3   :  { %v1507_v9 = vpack.c.bf16 %v178_v5, %v177_v3  ;;  %v179_v10 = vld [vmem:[%s1764_s5 + $0x10] sm:$0xff]  ;;  %v180_v11 = vld [vmem:[%s1764_s5 + $0x18] sm:$0xff]  ;;  %v1308_v12 = vpack.c.bf16 %v39_v7, %v38_v6  ;;  %v29_v14 = vld [vmem:[%s1765_s0] sm:$0xff]  ;;  %v182_v27 = vand.u32 127, %v181_v25 }
   0x4   :  { %1306 = vmatpush3.bf16.msra.mxu1 %v1305_v4  ;;  %v1517_v13 = vpack.c.bf16 %v180_v11, %v179_v10  ;;  %v186_v15 = vld [vmem:[%s1766_s1] sm:$0xff]  ;;  %v30_v39 = vld [vmem:[%s1765_s0 + $0x8] sm:$0xff]  ;;  %v31_v40 = vld [vmem:[%s1765_s0 + $0x10] sm:$0xff] }
   0x5   :  { %1312 = vmatpush3.bf16.msra.mxu0 %v1507_v9  ;;  %1307 = vmatprep.subr.bf16.mxu1 %v1433_v0  ;;  %v1542_v16 = vld [vmem:[%s1767_s3] sm:$0xff]  ;;  %vm183_vm2 = vcmp.ge.s32.totalorder %v182_v27, 64  ;;  %vm184_vm3 = vcmp.lt.s32.totalorder %v182_v27, 96  ;;  %s1436_s3 = smov 64   ;;  %v32_v41 = vld [vmem:[%s1765_s0 + $0x18] sm:$0xff]  ;;  %v941_v45 = vld [vmem:[%s1769_s6 + $0x8] sm:$0xff] }
   0x6   :  { %1313 = vmatprep.subr.bf16.mxu0 %v1433_v0  ;;  %vm1545_vm4 = vmand %vm183_vm2, %vm184_vm3  ;;  %v187_v32 = vld [vmem:[%s1768_s2] sm:$0xff]  ;;  %v34_v46 = vld [vmem:[%s1765_s0 + $0x28] sm:$0xff] }
   0x7   :  { %v33_v43 = vld [vmem:[%s1765_s0 + $0x20] sm:$0xff]  ;;  %v942_v48 = vld [vmem:[%s1769_s6 + $0x10] sm:$0xff]  ;;  %v943_v49 = vld [vmem:[%s1769_s6 + $0x18] sm:$0xff] }
   0x8   :  { %1309 = vmatpush3.bf16.msra.mxu1 %v1308_v12  ;;  %v940_v44 = vld [vmem:[%s1769_s6] sm:$0xff]  ;;  %v35_v50 = vld [vmem:[%s1765_s0 + $0x30] sm:$0xff]  ;;  %v1356_v51 = vpack.c.bf16 %v943_v49, %v942_v48 }
   0x9   :  { %1315 = vmatpush3.bf16.msra.mxu0 %v1517_v13  ;;  %1352 = vmatprep.subr.bf16.mxu1 %v1433_v0  ;;  %v1353_v47 = vpack.c.bf16 %v941_v45, %v940_v44  ;;  %v1636_v12 = vld [vmem:[%s1770_s7] ss:$0 sm:$0xff] }
   0xa   :  { %1316 = vmatprep.subr.bf16.mxu0 %v1433_v0 }
   0xb   :  { %1178 = vmatmul.mubr.msk.f32.vlgmr.msra.gmra.mrb[0].mxu1 %vm40_vm1, %v29_v14 }
   0xc   :  { %1207 = vmatmul.mubr.msk.f32.vlgmr.msra.gmra.mrb[0].mxu0 %vm40_vm1, %v186_v15  ;;  %1180 = vmatprep.mubr.msk.f32.mxu1 %vm1434_vm0, %v1435_v8 }
   0xd   :  { %1318 = vmatpush3.bf16.msra.mxu0 %v1507_v9  ;;  %1217 = vmatprep.mubr.msk.f32.mxu0 %vm1434_vm0, %v1435_v8 }
   0xe   :  { %1319 = vmatprep.subr.bf16.mxu0 %v1433_v0  ;;  %1354 = vmatpush3.bf16.msra.mxu1 %v1353_v47 }
   0xf   :  { %1181 = vmatmul.mubr.msk.f32.gmra.mrb[2].mxu1 %vm40_vm1, %v30_v39  ;;  %1355 = vmatprep.subr.bf16.mxu1 %v1433_v0 }
  0x10   :  { %1183 = vmatprep.mubr.msk.f32.mxu1 %vm1434_vm0, %v1435_v8 }
  0x11   :  { %1321 = vmatpush3.bf16.msra.mxu0 %v1517_v13 }
  0x12   :  { %1322 = vmatprep.subr.bf16.mxu0 %v1433_v0  ;;  %1357 = vmatpush3.bf16.msra.mxu1 %v1356_v51 }
  0x13   :  { %1184 = vmatmul.mubr.msk.f32.gmra.mrb[4].mxu1 %vm40_vm1, %v31_v40 }
  0x14   :  { %1186 = vmatprep.mubr.msk.f32.mxu1 %vm1434_vm0, %v1435_v8 }
  0x17   :  { %1187 = vmatmul.mubr.msk.f32.gmra.mrb[6].mxu1 %vm40_vm1, %v32_v41 }
  0x18   :  { %1189 = vmatprep.mubr.msk.f32.mxu1 %vm1434_vm0, %v1435_v8 }
  0x1b   :  { %1190 = vmatmul.mubr.msk.f32.gmra.mrb[8].mxu1 %vm40_vm1, %v33_v43 }
  0x1c   :  { %1192 = vmatprep.mubr.msk.f32.mxu1 %vm1434_vm0, %v1435_v8 }
  0x1f   :  { %1193 = vmatmul.mubr.msk.f32.gmra.mrb[10].mxu1 %vm40_vm1, %v34_v46 }
  0x20   :  { %1195 = vmatprep.mubr.msk.f32.mxu1 %vm1434_vm0, %v1435_v8 }
  0x23   :  { %1196 = vmatmul.mubr.msk.f32.gmra.mrb[12].mxu1 %vm40_vm1, %v35_v50 }
  0x24   :  { %1283 = vmatprep.mubr.msk.f32.mxu1 %vm1434_vm0, %v1435_v8 }
  0xde   :  { %v128_v17 = vpop.f32.mrb[0].mxu1 }
  0xdf   :  { %v163_v18 = vadd.f32 %v1542_v16, %v128_v17  ;;  %v1179_v19 = vpop.f32.mrb[1].mxu1  ;;  %v258_v20 = vpop.f32.mrb[0].mxu0 }
  0xe0   :  { %v1208_v21 = vpop.f32.mrb[1].mxu0 }
  0xe1   :  { %v262_v22 = vadd.f32 %v258_v20, %v163_v18 }
  0xe2   :  { %v133_v54 = vpop.f32.mrb[2].mxu1 }
  0xe3   :  { %v1091_v23 = vmul.f32 -1.442695, %v262_v22  ;;  %v1182_v55 = vpop.f32.mrb[3].mxu1  ;;  %v164_v5 = vadd.f32 %v1542_v16, %v133_v54 }
  0xe5   :  { %1377 = vpow2.f32 %v1091_v23 }
  0xe6   :  { %1379 = vtanh.f32 %v262_v22  ;;  %v1611_v56 = vpop.f32.mrb[4].mxu1 }
  0xe7   :  { %v1185_v57 = vpop.f32.mrb[5].mxu1 }
  0xea   :  { %v1613_v58 = vpop.f32.mrb[6].mxu1 }
  0xeb   :  { %v1188_v59 = vpop.f32.mrb[7].mxu1  ;;  %v166_v57 = vadd.f32 %v1542_v16, %v1613_v58 }
  0xee   :  { %v1626_v62 = vpop.f32.mrb[8].mxu1 }
  0xef   :  { %v1378_v24 = vpop.eup %1377  ;;  %v1191_v63 = vpop.f32.mrb[9].mxu1 }
  0xf0   :  { %v267_v26 = vadd.f32 1.0, %v1378_v24  ;;  %v1380_v29 = vpop.eup %1379 }
  0xf2   :  { %1381 = vrcp.f32 %v267_v26  ;;  %v1628_v1 = vpop.f32.mrb[10].mxu1 }
  0xf3   :  { %v1194_v2 = vpop.f32.mrb[11].mxu1 }
  0xf6   :  { %v1630_v3 = vpop.f32.mrb[12].mxu1 }
  0xf7   :  { %v1197_v4 = vpop.f32.mrb[13].mxu1 }
  0xfc   :  { %v1382_v30 = vpop.eup %1381 }
  0xfd   :  { %v270_v31 = vsel %vm1545_vm4, %v1380_v29, %v1382_v30 }
  0xfe   :  { %277 = vrot.lane.b32.xlu0 %v270_v31, %s1436_s3 }
 0x102   :  { %272 = vrot.lane.b32.xlu0 %v187_v32, %s1437_s26 }
 0x170   :  { %v278_v33 = vpop.permute.xlu0 %277 }
 0x171   :  { %v280_v34 = vmul.f32 %v278_v33, %v270_v31 }
 0x173   :  { %282 = vrot.lane.b32.xlu1 %v280_v34, %s1437_s26  ;;  %v165_v34 = vadd.f32 %v1542_v16, %v1611_v56 }
 0x174   :  { %v273_v35 = vpop.permute.xlu0 %272 }
 0x175   :  { %v275_v36 = vmul.f32 %v273_v35, %v270_v31 }
 0x1e5   :  { %v283_v37 = vpop.permute.xlu1 %282 }
 0x1e6   :  { %v1557_v38 = vadd.f32 %v283_v37, %v275_v36 }
 0x1e8   :  { %1383 = vtanh.f32 %v1557_v38 }
 0x1f2   :  { %v1384_v42 = vpop.eup %1383 }
 0x1f3   :  { %288 = vrot.lane.b32.xlu1 %v1384_v42, %s1436_s3 }
 0x265   :  { %v289_v52 = vpop.permute.xlu1 %288 }
 0x266   :  { %v291_v53 = vmul.f32 %v289_v52, %v270_v31 }
 0x268   :  { %293 = vrot.lane.b32.xlu0 %v291_v53, %s1437_s26 }
 0x2da   :  { %v294_v60 = vpop.permute.xlu0 %293 }
 0x2db   :  { %296 = vst.msk [vmem:[#allocation3] sm:$0xff] %vm40_vm1, %v294_v60  ;;  %1218 = vmatmul.mubr.msk.f32.vlgmr.msra.gmra.mrb[2].mxu0 %vm40_vm1, %v294_v60 }
 0x2dc   :  { %1324 = vmatpush3.bf16.msra.mxu0 %v1507_v9  ;;  %1228 = vmatprep.mubr.msk.f32.mxu0 %vm1434_vm0, %v1435_v8 }
 0x2dd   :  { %1325 = vmatprep.subr.bf16.mxu0 %v1433_v0 }
 0x2e0   :  { %1327 = vmatpush3.bf16.msra.mxu0 %v1517_v13 }
 0x2e1   :  { %1328 = vmatprep.subr.bf16.mxu0 %v1433_v0 }
 0x2e2   :  { %v933_v61 = vld [vmem:[#allocation3] sm:$0xff] }
 0x2e3   :  { %1284 = vmatmul.mubr.msk.f32.vlgmr.msra.gmra.mrb[14].mxu1 %vm40_vm1, %v933_v61 }
 0x2e4   :  { %1286 = vmatprep.mubr.msk.f32.mxu1 %vm1434_vm0, %v1435_v8 }
 0x3ae   :  { %v367_v6 = vpop.f32.mrb[2].mxu0 }
 0x3af   :  { %v371_v7 = vadd.f32 %v367_v6, %v164_v5  ;;  %v1219_v10 = vpop.f32.mrb[3].mxu0 }
 0x3b1   :  { %v1093_v11 = vmul.f32 -1.442695, %v371_v7 }
 0x3b3   :  { %1385 = vpow2.f32 %v1093_v11 }
 0x3b4   :  { %1387 = vtanh.f32 %v371_v7 }
 0x3b6   :  { %v1038_v14 = vpop.f32.mrb[14].mxu1 }
 0x3b7   :  { %v1039_v15 = vadd.f32 %v1636_v12, %v1038_v14  ;;  %v1285_v17 = vpop.f32.mrb[15].mxu1 }
 0x3b9   :  { %1072 = vst [vmem:[%s1771_s8] sm:$0xff] %v1039_v15 }
 0x3bd   :  { %v1386_v18 = vpop.eup %1385 }
 0x3be   :  { %v376_v19 = vadd.f32 1.0, %v1386_v18  ;;  %v1388_v20 = vpop.eup %1387 }
 0x3c0   :  { %1389 = vrcp.f32 %v376_v19 }
 0x3ca   :  { %v1390_v21 = vpop.eup %1389 }
 0x3cb   :  { %v379_v22 = vsel %vm1545_vm4, %v1388_v20, %v1390_v21 }
 0x3cc   :  { %382 = vrot.lane.b32.xlu1 %v379_v22, %s1436_s3  ;;  %v380_v25 = vmul.f32 %v379_v22, %v1557_v38 }
 0x43e   :  { %v383_v23 = vpop.permute.xlu1 %382 }
 0x43f   :  { %v385_v24 = vmul.f32 %v383_v23, %v379_v22 }
 0x441   :  { %387 = vrot.lane.b32.xlu0 %v385_v24, %s1437_s26 }
 0x4b3   :  { %v388_v26 = vpop.permute.xlu0 %387 }
 0x4b4   :  { %v390_v27 = vadd.f32 %v388_v26, %v380_v25  ;;  %v167_v25 = vadd.f32 %v1542_v16, %v1626_v62 }
 0x4b6   :  { %1391 = vtanh.f32 %v390_v27 }
 0x4c0   :  { %v1392_v29 = vpop.eup %1391 }
 0x4c1   :  { %393 = vrot.lane.b32.xlu1 %v1392_v29, %s1436_s3 }
 0x533   :  { %v394_v30 = vpop.permute.xlu1 %393 }
 0x534   :  { %v396_v31 = vmul.f32 %v394_v30, %v379_v22 }
 0x536   :  { %398 = vrot.lane.b32.xlu0 %v396_v31, %s1437_s26 }
 0x5a8   :  { %v399_v32 = vpop.permute.xlu0 %398 }
 0x5a9   :  { %402 = vst.msk [vmem:[#allocation3 + $0x8] sm:$0xff] %vm40_vm1, %v399_v32  ;;  %1229 = vmatmul.mubr.msk.f32.vlgmr.msra.gmra.mrb[4].mxu0 %vm40_vm1, %v399_v32 }
 0x5aa   :  { %1330 = vmatpush3.bf16.msra.mxu0 %v1507_v9  ;;  %1239 = vmatprep.mubr.msk.f32.mxu0 %vm1434_vm0, %v1435_v8 }
 0x5ab   :  { %1331 = vmatprep.subr.bf16.mxu0 %v1433_v0 }
 0x5ae   :  { %1333 = vmatpush3.bf16.msra.mxu0 %v1517_v13 }
 0x5af   :  { %1334 = vmatprep.subr.bf16.mxu0 %v1433_v0 }
 0x5b0   :  { %v934_v33 = vld [vmem:[#allocation3 + $0x8] sm:$0xff] }
 0x5b1   :  { %1287 = vmatmul.mubr.msk.f32.gmra.mrb[16].mxu1 %vm40_vm1, %v934_v33 }
 0x5b2   :  { %1289 = vmatprep.mubr.msk.f32.mxu1 %vm1434_vm0, %v1435_v8 }
 0x67c   :  { %v473_v35 = vpop.f32.mrb[4].mxu0 }
 0x67d   :  { %v477_v36 = vadd.f32 %v473_v35, %v165_v34  ;;  %v1230_v37 = vpop.f32.mrb[5].mxu0 }
 0x67f   :  { %v1095_v38 = vmul.f32 -1.442695, %v477_v36 }
 0x681   :  { %1393 = vpow2.f32 %v1095_v38 }
 0x682   :  { %1395 = vtanh.f32 %v477_v36 }
 0x684   :  { %v1043_v39 = vpop.f32.mrb[16].mxu1 }
 0x685   :  { %v1044_v40 = vadd.f32 %v1636_v12, %v1043_v39  ;;  %v1288_v41 = vpop.f32.mrb[17].mxu1 }
 0x687   :  { %1073 = vst [vmem:[%s1771_s8 + $0x8] sm:$0xff] %v1044_v40 }
 0x68b   :  { %v1394_v42 = vpop.eup %1393 }
 0x68c   :  { %v482_v43 = vadd.f32 1.0, %v1394_v42  ;;  %v1396_v44 = vpop.eup %1395 }
 0x68e   :  { %1397 = vrcp.f32 %v482_v43 }
 0x698   :  { %v1398_v45 = vpop.eup %1397 }
 0x699   :  { %v485_v46 = vsel %vm1545_vm4, %v1396_v44, %v1398_v45 }
 0x69a   :  { %488 = vrot.lane.b32.xlu1 %v485_v46, %s1436_s3  ;;  %v486_v49 = vmul.f32 %v485_v46, %v390_v27 }
 0x70c   :  { %v489_v47 = vpop.permute.xlu1 %488 }
 0x70d   :  { %v491_v48 = vmul.f32 %v489_v47, %v485_v46 }
 0x70f   :  { %493 = vrot.lane.b32.xlu0 %v491_v48, %s1437_s26  ;;  %v168_v48 = vadd.f32 %v1542_v16, %v1628_v1 }
 0x781   :  { %v494_v50 = vpop.permute.xlu0 %493 }
 0x782   :  { %v496_v51 = vadd.f32 %v494_v50, %v486_v49 }
 0x784   :  { %1399 = vtanh.f32 %v496_v51 }
 0x78e   :  { %v1400_v52 = vpop.eup %1399 }
 0x78f   :  { %499 = vrot.lane.b32.xlu1 %v1400_v52, %s1436_s3 }
 0x801   :  { %v500_v53 = vpop.permute.xlu1 %499 }
 0x802   :  { %v502_v54 = vmul.f32 %v500_v53, %v485_v46 }
 0x804   :  { %504 = vrot.lane.b32.xlu0 %v502_v54, %s1437_s26 }
 0x876   :  { %v505_v55 = vpop.permute.xlu0 %504 }
 0x877   :  { %508 = vst.msk [vmem:[#allocation3 + $0x10] sm:$0xff] %vm40_vm1, %v505_v55  ;;  %1240 = vmatmul.mubr.msk.f32.vlgmr.msra.gmra.mrb[6].mxu0 %vm40_vm1, %v505_v55 }
 0x878   :  { %1336 = vmatpush3.bf16.msra.mxu0 %v1507_v9  ;;  %1250 = vmatprep.mubr.msk.f32.mxu0 %vm1434_vm0, %v1435_v8 }
 0x879   :  { %1337 = vmatprep.subr.bf16.mxu0 %v1433_v0 }
 0x87c   :  { %1339 = vmatpush3.bf16.msra.mxu0 %v1517_v13 }
 0x87d   :  { %1340 = vmatprep.subr.bf16.mxu0 %v1433_v0 }
 0x87e   :  { %v935_v56 = vld [vmem:[#allocation3 + $0x10] sm:$0xff] }
 0x87f   :  { %1290 = vmatmul.mubr.msk.f32.gmra.mrb[18].mxu1 %vm40_vm1, %v935_v56 }
 0x880   :  { %1292 = vmatprep.mubr.msk.f32.mxu1 %vm1434_vm0, %v1435_v8 }
 0x94a   :  { %v579_v59 = vpop.f32.mrb[6].mxu0 }
 0x94b   :  { %v583_v60 = vadd.f32 %v579_v59, %v166_v57  ;;  %v1241_v61 = vpop.f32.mrb[7].mxu0 }
 0x94d   :  { %v1097_v63 = vmul.f32 -1.442695, %v583_v60 }
 0x94f   :  { %1401 = vpow2.f32 %v1097_v63 }
 0x950   :  { %1403 = vtanh.f32 %v583_v60 }
 0x952   :  { %v1048_v2 = vpop.f32.mrb[18].mxu1 }
 0x953   :  { %v1049_v4 = vadd.f32 %v1636_v12, %v1048_v2  ;;  %v1291_v5 = vpop.f32.mrb[19].mxu1 }
 0x955   :  { %1074 = vst [vmem:[%s1771_s8 + $0x10] sm:$0xff] %v1049_v4 }
 0x959   :  { %v1402_v6 = vpop.eup %1401 }
 0x95a   :  { %v588_v7 = vadd.f32 1.0, %v1402_v6  ;;  %v1404_v10 = vpop.eup %1403 }
 0x95c   :  { %1405 = vrcp.f32 %v588_v7 }
 0x966   :  { %v1406_v11 = vpop.eup %1405 }
 0x967   :  { %v591_v58 = vsel %vm1545_vm4, %v1404_v10, %v1406_v11  ;;  %v169_v10 = vadd.f32 %v1542_v16, %v1630_v3 }
 0x968   :  { %594 = vrot.lane.b32.xlu1 %v591_v58, %s1436_s3  ;;  %v592_v17 = vmul.f32 %v591_v58, %v496_v51 }
 0x9da   :  { %v595_v14 = vpop.permute.xlu1 %594 }
 0x9db   :  { %v597_v15 = vmul.f32 %v595_v14, %v591_v58 }
 0x9dd   :  { %599 = vrot.lane.b32.xlu0 %v597_v15, %s1437_s26 }
 0xa4f   :  { %v600_v18 = vpop.permute.xlu0 %599 }
 0xa50   :  { %v602_v19 = vadd.f32 %v600_v18, %v592_v17 }
 0xa52   :  { %1407 = vtanh.f32 %v602_v19 }
 0xa5c   :  { %v1408_v20 = vpop.eup %1407 }
 0xa5d   :  { %605 = vrot.lane.b32.xlu1 %v1408_v20, %s1436_s3 }
 0xacf   :  { %v606_v21 = vpop.permute.xlu1 %605 }
 0xad0   :  { %v608_v22 = vmul.f32 %v606_v21, %v591_v58 }
 0xad2   :  { %610 = vrot.lane.b32.xlu0 %v608_v22, %s1437_s26 }
 0xb44   :  { %v611_v23 = vpop.permute.xlu0 %610 }
 0xb45   :  { %614 = vst.msk [vmem:[#allocation3 + $0x18] sm:$0xff] %vm40_vm1, %v611_v23  ;;  %1251 = vmatmul.mubr.msk.f32.vlgmr.msra.gmra.mrb[8].mxu0 %vm40_vm1, %v611_v23 }
 0xb46   :  { %1342 = vmatpush3.bf16.msra.mxu0 %v1507_v9  ;;  %1261 = vmatprep.mubr.msk.f32.mxu0 %vm1434_vm0, %v1435_v8 }
 0xb47   :  { %1343 = vmatprep.subr.bf16.mxu0 %v1433_v0 }
 0xb4a   :  { %1345 = vmatpush3.bf16.msra.mxu0 %v1517_v13 }
 0xb4b   :  { %1346 = vmatprep.subr.bf16.mxu0 %v1433_v0 }
 0xb4c   :  { %v936_v24 = vld [vmem:[#allocation3 + $0x18] sm:$0xff] }
 0xb4d   :  { %1293 = vmatmul.mubr.msk.f32.gmra.mrb[20].mxu1 %vm40_vm1, %v936_v24 }
 0xb4e   :  { %1295 = vmatprep.mubr.msk.f32.mxu1 %vm1434_vm0, %v1435_v8 }
 0xc18   :  { %v685_v26 = vpop.f32.mrb[8].mxu0 }
 0xc19   :  { %v689_v27 = vadd.f32 %v685_v26, %v167_v25  ;;  %v1252_v29 = vpop.f32.mrb[9].mxu0 }
 0xc1b   :  { %v1099_v30 = vmul.f32 -1.442695, %v689_v27 }
 0xc1d   :  { %1409 = vpow2.f32 %v1099_v30 }
 0xc1e   :  { %1411 = vtanh.f32 %v689_v27 }
 0xc20   :  { %v1053_v31 = vpop.f32.mrb[20].mxu1 }
 0xc21   :  { %v1054_v32 = vadd.f32 %v1636_v12, %v1053_v31  ;;  %v1294_v33 = vpop.f32.mrb[21].mxu1 }
 0xc23   :  { %1075 = vst [vmem:[%s1771_s8 + $0x18] sm:$0xff] %v1054_v32 }
 0xc27   :  { %v1410_v34 = vpop.eup %1409 }
 0xc28   :  { %v694_v35 = vadd.f32 1.0, %v1410_v34  ;;  %v1412_v36 = vpop.eup %1411 }
 0xc2a   :  { %1413 = vrcp.f32 %v694_v35 }
 0xc34   :  { %v1414_v37 = vpop.eup %1413 }
 0xc35   :  { %v697_v62 = vsel %vm1545_vm4, %v1412_v36, %v1414_v37 }
 0xc36   :  { %700 = vrot.lane.b32.xlu1 %v697_v62, %s1436_s3  ;;  %v698_v40 = vmul.f32 %v697_v62, %v602_v19 }
 0xca8   :  { %v701_v38 = vpop.permute.xlu1 %700 }
 0xca9   :  { %v703_v39 = vmul.f32 %v701_v38, %v697_v62 }
 0xcab   :  { %705 = vrot.lane.b32.xlu0 %v703_v39, %s1437_s26 }
 0xd1d   :  { %v706_v41 = vpop.permute.xlu0 %705 }
 0xd1e   :  { %v708_v42 = vadd.f32 %v706_v41, %v698_v40 }
 0xd20   :  { %1415 = vtanh.f32 %v708_v42 }
 0xd2a   :  { %v1416_v43 = vpop.eup %1415 }
 0xd2b   :  { %711 = vrot.lane.b32.xlu1 %v1416_v43, %s1436_s3 }
 0xd9d   :  { %v712_v44 = vpop.permute.xlu1 %711 }
 0xd9e   :  { %v714_v45 = vmul.f32 %v712_v44, %v697_v62 }
 0xda0   :  { %716 = vrot.lane.b32.xlu0 %v714_v45, %s1437_s26 }
 0xe12   :  { %v717_v46 = vpop.permute.xlu0 %716 }
 0xe13   :  { %720 = vst.msk [vmem:[#allocation3 + $0x20] sm:$0xff] %vm40_vm1, %v717_v46  ;;  %1262 = vmatmul.mubr.msk.f32.vlgmr.msra.gmra.mrb[10].mxu0 %vm40_vm1, %v717_v46 }
 0xe14   :  { %1348 = vmatpush3.bf16.msra.mxu0 %v1507_v9  ;;  %1272 = vmatprep.mubr.msk.f32.mxu0 %vm1434_vm0, %v1435_v8 }
 0xe15   :  { %1349 = vmatprep.subr.bf16.mxu0 %v1433_v0 }
 0xe18   :  { %1351 = vmatpush3.bf16.msra.mxu0 %v1517_v13 }
 0xe1a   :  { %v937_v47 = vld [vmem:[#allocation3 + $0x20] sm:$0xff] }
 0xe1b   :  { %1296 = vmatmul.mubr.msk.f32.gmra.mrb[22].mxu1 %vm40_vm1, %v937_v47 }
 0xe1c   :  { %1298 = vmatprep.mubr.msk.f32.mxu1 %vm1434_vm0, %v1435_v8 }
 0xee6   :  { %v791_v49 = vpop.f32.mrb[10].mxu0 }
 0xee7   :  { %v795_v50 = vadd.f32 %v791_v49, %v168_v48  ;;  %v1263_v51 = vpop.f32.mrb[11].mxu0 }
 0xee9   :  { %v1101_v9 = vmul.f32 -1.442695, %v795_v50 }
 0xeeb   :  { %1417 = vpow2.f32 %v1101_v9 }
 0xeec   :  { %1419 = vtanh.f32 %v795_v50 }
 0xeee   :  { %v1058_v52 = vpop.f32.mrb[22].mxu1 }
 0xeef   :  { %v1059_v53 = vadd.f32 %v1636_v12, %v1058_v52  ;;  %v1297_v0 = vpop.f32.mrb[23].mxu1 }
 0xef1   :  { %1076 = vst [vmem:[%s1771_s8 + $0x20] sm:$0xff] %v1059_v53 }
 0xef5   :  { %v1418_v13 = vpop.eup %1417 }
 0xef6   :  { %v800_v54 = vadd.f32 1.0, %v1418_v13  ;;  %v1420_v55 = vpop.eup %1419 }
 0xef8   :  { %1421 = vrcp.f32 %v800_v54 }
 0xf02   :  { %v1422_v56 = vpop.eup %1421 }
 0xf03   :  { %v803_v1 = vsel %vm1545_vm4, %v1420_v55, %v1422_v56 }
 0xf04   :  { %806 = vrot.lane.b32.xlu1 %v803_v1, %s1436_s3  ;;  %v804_v60 = vmul.f32 %v803_v1, %v708_v42 }
 0xf76   :  { %v807_v57 = vpop.permute.xlu1 %806 }
 0xf77   :  { %v809_v59 = vmul.f32 %v807_v57, %v803_v1 }
 0xf79   :  { %811 = vrot.lane.b32.xlu0 %v809_v59, %s1437_s26 }
 0xfeb   :  { %v812_v61 = vpop.permute.xlu0 %811 }
 0xfec   :  { %v814_v63 = vadd.f32 %v812_v61, %v804_v60 }
 0xfee   :  { %1423 = vtanh.f32 %v814_v63 }
 0xff8   :  { %v1424_v2 = vpop.eup %1423 }
 0xff9   :  { %817 = vrot.lane.b32.xlu1 %v1424_v2, %s1436_s3 }
0x106b   :  { %v818_v4 = vpop.permute.xlu1 %817 }
0x106c   :  { %v820_v5 = vmul.f32 %v818_v4, %v803_v1 }
0x106e   :  { %822 = vrot.lane.b32.xlu0 %v820_v5, %s1437_s26 }
0x10e0   :  { %v823_v6 = vpop.permute.xlu0 %822 }
0x10e1   :  { %826 = vst.msk [vmem:[#allocation3 + $0x28] sm:$0xff] %vm40_vm1, %v823_v6  ;;  %1273 = vmatmul.mubr.msk.f32.vlgmr.msra.gmra.mrb[12].mxu0 %vm40_vm1, %v823_v6 }
0x10e8   :  { %v938_v7 = vld [vmem:[#allocation3 + $0x28] sm:$0xff] }
0x10e9   :  { %1299 = vmatmul.mubr.msk.f32.gmra.mrb[24].mxu1 %vm40_vm1, %v938_v7 }
0x10ea   :  { %1301 = vmatprep.mubr.msk.f32.mxu1 %vm1434_vm0, %v1435_v8 }
0x11b4   :  { %v897_v11 = vpop.f32.mrb[12].mxu0 }
0x11b5   :  { %v901_v58 = vadd.f32 %v897_v11, %v169_v10  ;;  %v1274_v14 = vpop.f32.mrb[13].mxu0 }
0x11b7   :  { %v1103_v15 = vmul.f32 -1.442695, %v901_v58 }
0x11b9   :  { %1425 = vpow2.f32 %v1103_v15 }
0x11ba   :  { %1427 = vtanh.f32 %v901_v58 }
0x11bc   :  { %v1063_v17 = vpop.f32.mrb[24].mxu1 }
0x11bd   :  { %v1064_v18 = vadd.f32 %v1636_v12, %v1063_v17  ;;  %v1300_v19 = vpop.f32.mrb[25].mxu1 }
0x11bf   :  { %1077 = vst [vmem:[%s1771_s8 + $0x28] sm:$0xff] %v1064_v18 }
0x11c3   :  { %v1426_v20 = vpop.eup %1425 }
0x11c4   :  { %v906_v21 = vadd.f32 1.0, %v1426_v20  ;;  %v1428_v8 = vpop.eup %1427 }
0x11c6   :  { %1429 = vrcp.f32 %v906_v21 }
0x11d0   :  { %v1430_v22 = vpop.eup %1429 }
0x11d1   :  { %v909_v16 = vsel %vm1545_vm4, %v1428_v8, %v1430_v22 }
0x11d2   :  { %912 = vrot.lane.b32.xlu1 %v909_v16, %s1436_s3  ;;  %v910_v24 = vmul.f32 %v909_v16, %v814_v63 }
0x1244   :  { %v913_v3 = vpop.permute.xlu1 %912 }
0x1245   :  { %v915_v23 = vmul.f32 %v913_v3, %v909_v16 }
0x1247   :  { %917 = vrot.lane.b32.xlu0 %v915_v23, %s1437_s26 }
0x12b9   :  { %v918_v25 = vpop.permute.xlu0 %917 }
0x12ba   :  { %v920_v26 = vadd.f32 %v918_v25, %v910_v24 }
0x12bc   :  { %1431 = vtanh.f32 %v920_v26 }
0x12c6   :  { %v1432_v27 = vpop.eup %1431 }
0x12c7   :  { %923 = vrot.lane.b32.xlu1 %v1432_v27, %s1436_s3 }
0x1339   :  { %v924_v29 = vpop.permute.xlu1 %923 }
0x133a   :  { %v926_v30 = vmul.f32 %v924_v29, %v909_v16 }
0x133c   :  { %928 = vrot.lane.b32.xlu0 %v926_v30, %s1437_s26 }
0x13ae   :  { %v929_v31 = vpop.permute.xlu0 %928 }
0x13af   :  { %932 = vst.msk [vmem:[#allocation3 + $0x30] sm:$0xff] %vm40_vm1, %v929_v31 }
0x13b6   :  { %v939_v28 = vld [vmem:[#allocation3 + $0x30] sm:$0xff] }
0x13b7   :  { %1302 = vmatmul.mubr.msk.f32.gmra.mrb[26].mxu1 %vm40_vm1, %v939_v28 }
0x148a   :  { %v1068_v32 = vpop.f32.mrb[26].mxu1 }
0x148b   :  { %v1069_v33 = vadd.f32 %v1636_v12, %v1068_v32  ;;  %v1303_v34 = vpop.f32.mrb[27].mxu1 }
0x148d   :  { %1078 = vst [vmem:[%s1771_s8 + $0x30] sm:$0xff] %v1069_v33 }

</bundles_post_ra>
